<compile_context>
chip_gen: v5e
topology: v5e:2x2
jax: 0.10.0
libtpu: 0.0.40
codegen_flags: <defaults>
</compile_context>

<pallas_src>
import jax
import jax.numpy as jnp
from jax.experimental import pallas as pl
from jax.experimental.pallas import tpu as pltpu

EPS = 1e-5  # nn.BatchNorm1d default eps


def user_info_mixing_kernel(x_ref, wv_ref, wu_ref, pv_ref, pu_ref, w2_ref,
                            b2_ref, gamma_ref, beta_ref, b1_ref,
                            o_ref, h_ref):
    B, A, S, C = x_ref.shape
    A1 = A - 1                       # transaction rows
    M = B * S

    x = x_ref[...]                   # [B, A, S, C]  native layout, no wrapper transpose
    xv = x[:, :A1]                   # [B, A1, S, C] transaction rows
    xu = x[:, A1]                    # [B, S, C]     user row per (b, s)

    wv = wv_ref[...]                 # [1, C] U1 weight, transaction half
    wu = wu_ref[...]                 # [1, C] U1 weight, user half
    pv = pv_ref[...]                 # [1, C] p_pad, transaction half
    pu = pu_ref[...]                 # [1, C] p_pad, user half
    b1 = b1_ref[0]                   # U1 bias (scalar, SMEM)

    # ---- AdaptiveU1 logits, vectorized over the A1 transaction slots --------------
    lv = jnp.sum(xv * wv, axis=-1, keepdims=True)                   # [B, A1, S, 1]
    lub = jnp.sum(xu * wu, axis=-1, keepdims=True) + b1             # [B, S, 1] (bias hoisted)
    logits = jnp.maximum(lv + lub[:, None], 0.0)                    # [B, A1, S, 1]
    lp = jnp.maximum(jnp.sum(pv * wv + pu * wu, axis=-1,
                             keepdims=True) + b1, 0.0)              # [1, 1] pad slot

    # ---- softmax over the A = A1 + 1 mixing slots ----------------------------------
    m = jnp.maximum(jnp.max(logits, axis=1), lp)                    # [B, S, 1]
    ea = jnp.exp(logits - m[:, None])                               # [B, A1, S, 1]
    ep = jnp.exp(lp - m)                                            # [B, S, 1]
    denom = jnp.sum(ea, axis=1) + ep                                # [B, S, 1]
    inv = pl.reciprocal(denom, approx=True)                         # EUP slot
    inv = inv * (2.0 - denom * inv)                                 # one Newton step
    wa = ea * inv[:, None]                                          # [B, A1, S, 1]
    wp = ep * inv                                                   # [B, S, 1]
    wsum = 1.0 - wp                                                 # = sum_a wa

    # ---- softmax-weighted mix of x_v_pad rows (concat never materialised) ----------
    mixed_v = jnp.sum(wa * xv, axis=1) + wp * pv                    # [B, S, C] first C feats
    mixed_u = wsum * xu + wp * pu                                   # [B, S, C] second C feats

    # ---- U2: ONE fused [M, 2C] x [2C, C] MXU matmul ---------------------------------
    h_ref[:, 0:C] = jnp.maximum(mixed_v, 0.0).reshape(M, C)
    h_ref[:, C:2 * C] = jnp.maximum(mixed_u, 0.0).reshape(M, C)
    y = jnp.dot(h_ref[...], w2_ref[...],
                preferred_element_type=jnp.float32) + b2_ref[...]   # [M, C]

    # ---- residual + TimeBatchNorm2d, lane-dense in [B, S*C] --------------------------
    z3 = y.reshape(B, S, C) + xu                                    # [B, S, C] residual
    zf = z3.reshape(B, S * C)                                       # lane-dense layout
    mean = jnp.mean(zf, axis=0, keepdims=True)                      # [1, S*C]
    d = zf - mean
    var = jnp.mean(d * d, axis=0, keepdims=True)                    # biased var (training BN)
    scale = gamma_ref[...] * jax.lax.rsqrt(var + EPS)               # [1, S*C]
    shift = beta_ref[...] - mean * scale                            # [1, S*C]
    o_ref[...] = zf * scale + shift                                 # single full-lane store


def user_info_mixing(x, u1_w, u1_b, p_pad, u2_w, u2_b, bn_gamma, bn_beta):
    """x: [B, A, S, C] exactly as passed to UserInfoMixing.forward (pre-permute)."""
    B, A, S, C = x.shape
    A1 = A - 1
    M = B * S

    # Parameter plumbing only (tiny, trace-time): split U1/p_pad halves, fuse+transpose
    # U2 into a single [2C, C] weight, lane-dense BN affine. The activation `x` is
    # passed untouched in its native layout.
    wv = u1_w[:, :C].reshape(1, C)
    wu = u1_w[:, C:].reshape(1, C)
    pv = p_pad[:C].reshape(1, C)
    pu = p_pad[C:].reshape(1, C)
    w2_t = jnp.transpose(u2_w)                                      # [2C, C]
    b2 = u2_b.reshape(1, C)
    gamma = bn_gamma.reshape(1, S * C)
    beta = bn_beta.reshape(1, S * C)
    b1 = u1_b.reshape(1)

    vmem = pl.BlockSpec(memory_space=pltpu.MemorySpace.VMEM)
    smem = pl.BlockSpec(memory_space=pltpu.MemorySpace.SMEM)

    flops = (6 * M * A1 * C          # U1 logits + softmax-weighted mixing
             + 4 * M * C * C         # fused U2 matmul
             + 14 * M * C)           # relu / residual / batch-norm
    transcendentals = M * (A1 + 2) + S * C                           # exp + rcp + rsqrt
    bytes_accessed = 4 * (B * A * S * C + M * C + 2 * C * C + (2 * S + 5) * C + 1)

    out_flat = pl.pallas_call(
        user_info_mixing_kernel,
        out_shape=jax.ShapeDtypeStruct((B, S * C), jnp.float32),
        in_specs=[vmem, vmem, vmem, vmem, vmem, vmem, vmem, vmem, vmem, smem],
        out_specs=vmem,
        scratch_shapes=[pltpu.VMEM((M, 2 * C), jnp.float32)],
        compiler_params=pltpu.CompilerParams(vmem_limit_bytes=32 * 1024 * 1024),
        cost_estimate=pl.CostEstimate(flops=flops,
                                      transcendentals=transcendentals,
                                      bytes_accessed=bytes_accessed),
    )(x, wv, wu, pv, pu, w2_t, b2, gamma, beta, b1)
    return out_flat.reshape(B, S, C)                                 # free leading split


def reference(x, u1_w, u1_b, p_pad, u2_w, u2_b, bn_gamma, bn_beta):
    """Pure-JAX mirror of UserInfoMixing.forward (mask=None, training-mode BN)."""
    B, A, S, C = x.shape
    hp = jax.lax.Precision.HIGHEST
    xp = jnp.transpose(x, (0, 2, 1, 3))                              # [B, S, A, C]
    x_v = xp[:, :, :-1]                                              # [B, S, A-1, C]
    x_u = jnp.broadcast_to(xp[:, :, -1:], x_v.shape)
    x_v = jnp.concatenate([x_v, x_u], axis=-1)                       # [B, S, A-1, 2C]
    pad = jnp.broadcast_to(p_pad.reshape(1, 1, 1, 2 * C), (B, S, 1, 2 * C))
    x_vp = jnp.concatenate([x_v, pad], axis=2)                       # [B, S, A, 2C]
    logits = jnp.einsum("bsaf,f->bsa", x_vp, u1_w[0], precision=hp) + u1_b[0]
    mix_w = jax.nn.softmax(jnp.maximum(logits, 0.0), axis=-1)        # [B, S, A]
    mixed = jnp.maximum(jnp.einsum("bsa,bsaf->bsf", mix_w, x_vp, precision=hp), 0.0)
    mix_out = jnp.einsum("bsf,of->bso", mixed, u2_w, precision=hp) + u2_b
    z = mix_out + xp[:, :, -1]                                       # [B, S, C]
    zf = z.reshape(B, S * C)
    mean = zf.mean(axis=0, keepdims=True)
    var = ((zf - mean) ** 2).mean(axis=0, keepdims=True)             # biased (training BN)
    out = (zf - mean) / jnp.sqrt(var + EPS) * bn_gamma + bn_beta
    return out.reshape(B, S, C)


if __name__ == "__main__":
    # batch=2, A=5 rows along the mixing dim (4 transactions + 1 user row),
    # sequence_length=8, input_channels=32  ->  x: [B, A, S, C]
    B, A, S, C = 2, 5, 8, 32
    key = jax.random.PRNGKey(0)
    kx, k1, k2, k3, k4, k5, k6, k7 = jax.random.split(key, 8)

    x = jax.random.normal(kx, (B, A, S, C), jnp.float32)

    bound = 1.0 / ((2 * C) ** 0.5)       # nn.Linear(2C, .) default init bound
    u1_w = jax.random.uniform(k1, (1, 2 * C), jnp.float32, -bound, bound)
    u1_b = jax.random.uniform(k2, (1,), jnp.float32, -bound, bound)
    u2_w = jax.random.uniform(k3, (C, 2 * C), jnp.float32, -bound, bound)
    u2_b = jax.random.uniform(k4, (C,), jnp.float32, -bound, bound)
    p_pad = jax.random.normal(k5, (2 * C,), jnp.float32)
    # non-trivial BN affine so the folded scale/shift path is actually exercised
    bn_gamma = 1.0 + 0.1 * jax.random.normal(k6, (S * C,), jnp.float32)
    bn_beta = 0.1 * jax.random.normal(k7, (S * C,), jnp.float32)

    run = jax.jit(user_info_mixing)
    out = jax.block_until_ready(run(x, u1_w, u1_b, p_pad, u2_w, u2_b, bn_gamma, bn_beta))

    ref = reference(x, u1_w, u1_b, p_pad, u2_w, u2_b, bn_gamma, bn_beta)
    assert out.shape == (B, S, C)
    err = jnp.max(jnp.abs(out - ref))
    assert jnp.allclose(out, ref, atol=2e-4, rtol=2e-4), f"mismatch vs reference (max abs err {err})"
    print("KERNEL_OK")
</pallas_src>

<mosaic_0001>
module attributes {stable_mosaic.version = 11 : i64} {
  func.func @user_info_mixing_kernel(%arg0: memref<2x5x8x32xf32, #tpu.memory_space<vmem>>, %arg1: memref<1x32xf32, #tpu.memory_space<vmem>>, %arg2: memref<1x32xf32, #tpu.memory_space<vmem>>, %arg3: memref<1x32xf32, #tpu.memory_space<vmem>>, %arg4: memref<1x32xf32, #tpu.memory_space<vmem>>, %arg5: memref<64x32xf32, #tpu.memory_space<vmem>>, %arg6: memref<1x32xf32, #tpu.memory_space<vmem>>, %arg7: memref<1x256xf32, #tpu.memory_space<vmem>>, %arg8: memref<1x256xf32, #tpu.memory_space<vmem>>, %arg9: memref<1xf32, #tpu.memory_space<smem>>, %arg10: memref<2x256xf32, #tpu.memory_space<vmem>>, %arg11: memref<16x64xf32, #tpu.memory_space<vmem>>) attributes {dimension_semantics = [], scalar_prefetch = 0 : i64, scratch_operands = 1 : i64, tpu.core_type = #tpu.core_type<tc>} {
    %c0 = arith.constant 0 : index
    %c0_0 = arith.constant 0 : index
    %c0_1 = arith.constant 0 : index
    %c0_2 = arith.constant 0 : index
    %0 = vector.load %arg0[%c0, %c0_0, %c0_1, %c0_2] : memref<2x5x8x32xf32, #tpu.memory_space<vmem>>, vector<2x5x8x32xf32>
    %1 = vector.extract_strided_slice %0 {offsets = [0, 0, 0, 0], sizes = [2, 4, 8, 32], strides = [1, 1, 1, 1]} : vector<2x5x8x32xf32> to vector<2x4x8x32xf32>
    %2 = vector.extract_strided_slice %0 {offsets = [0, 4, 0, 0], sizes = [2, 1, 8, 32], strides = [1, 1, 1, 1]} : vector<2x5x8x32xf32> to vector<2x1x8x32xf32>
    %3 = vector.shape_cast %2 : vector<2x1x8x32xf32> to vector<2x8x32xf32>
    %c0_3 = arith.constant 0 : index
    %c0_4 = arith.constant 0 : index
    %4 = vector.load %arg1[%c0_3, %c0_4] : memref<1x32xf32, #tpu.memory_space<vmem>>, vector<1x32xf32>
    %c0_5 = arith.constant 0 : index
    %c0_6 = arith.constant 0 : index
    %5 = vector.load %arg2[%c0_5, %c0_6] : memref<1x32xf32, #tpu.memory_space<vmem>>, vector<1x32xf32>
    %c0_7 = arith.constant 0 : index
    %c0_8 = arith.constant 0 : index
    %6 = vector.load %arg3[%c0_7, %c0_8] : memref<1x32xf32, #tpu.memory_space<vmem>>, vector<1x32xf32>
    %c0_9 = arith.constant 0 : index
    %c0_10 = arith.constant 0 : index
    %7 = vector.load %arg4[%c0_9, %c0_10] : memref<1x32xf32, #tpu.memory_space<vmem>>, vector<1x32xf32>
    %c0_11 = arith.constant 0 : index
    %8 = memref.load %arg9[%c0_11] : memref<1xf32, #tpu.memory_space<smem>>
    %9 = vector.shape_cast %4 : vector<1x32xf32> to vector<1x1x1x32xf32>
    %10 = vector.broadcast %9 : vector<1x1x1x32xf32> to vector<2x4x8x32xf32>
    %11 = arith.mulf %1, %10 : vector<2x4x8x32xf32>
    %cst = arith.constant dense<0.000000e+00> : vector<2x4x8xf32>
    %12 = vector.multi_reduction <add>, %11, %cst [3] : vector<2x4x8x32xf32> to vector<2x4x8xf32>
    %13 = vector.shape_cast %12 : vector<2x4x8xf32> to vector<2x4x8x1xf32>
    %14 = vector.shape_cast %5 : vector<1x32xf32> to vector<1x1x32xf32>
    %15 = vector.broadcast %14 : vector<1x1x32xf32> to vector<2x8x32xf32>
    %16 = arith.mulf %3, %15 : vector<2x8x32xf32>
    %cst_12 = arith.constant dense<0.000000e+00> : vector<2x8xf32>
    %17 = vector.multi_reduction <add>, %16, %cst_12 [2] : vector<2x8x32xf32> to vector<2x8xf32>
    %18 = vector.shape_cast %17 : vector<2x8xf32> to vector<2x8x1xf32>
    %19 = vector.broadcast %8 : f32 to vector<2x8x1xf32>
    %20 = arith.addf %18, %19 : vector<2x8x1xf32>
    %21 = vector.shape_cast %20 : vector<2x8x1xf32> to vector<2x1x8x1xf32>
    %22 = vector.broadcast %21 : vector<2x1x8x1xf32> to vector<2x4x8x1xf32>
    %23 = arith.addf %13, %22 : vector<2x4x8x1xf32>
    %cst_13 = arith.constant 0.000000e+00 : f32
    %24 = vector.broadcast %cst_13 : f32 to vector<2x4x8x1xf32>
    %25 = arith.maximumf %23, %24 : vector<2x4x8x1xf32>
    %26 = arith.mulf %6, %4 : vector<1x32xf32>
    %27 = arith.mulf %7, %5 : vector<1x32xf32>
    %28 = arith.addf %26, %27 : vector<1x32xf32>
    %cst_14 = arith.constant dense<0.000000e+00> : vector<1xf32>
    %29 = vector.multi_reduction <add>, %28, %cst_14 [1] : vector<1x32xf32> to vector<1xf32>
    %30 = vector.shape_cast %29 : vector<1xf32> to vector<1x1xf32>
    %31 = vector.broadcast %8 : f32 to vector<1x1xf32>
    %32 = arith.addf %30, %31 : vector<1x1xf32>
    %cst_15 = arith.constant 0.000000e+00 : f32
    %33 = vector.broadcast %cst_15 : f32 to vector<1x1xf32>
    %34 = arith.maximumf %32, %33 : vector<1x1xf32>
    %cst_16 = arith.constant dense<0xFF800000> : vector<2x8x1xf32>
    %35 = vector.multi_reduction <maximumf>, %25, %cst_16 [1] : vector<2x4x8x1xf32> to vector<2x8x1xf32>
    %36 = vector.shape_cast %34 : vector<1x1xf32> to vector<1x1x1xf32>
    %37 = vector.broadcast %36 : vector<1x1x1xf32> to vector<2x8x1xf32>
    %38 = arith.maximumf %35, %37 : vector<2x8x1xf32>
    %39 = vector.shape_cast %38 : vector<2x8x1xf32> to vector<2x1x8x1xf32>
    %40 = vector.broadcast %39 : vector<2x1x8x1xf32> to vector<2x4x8x1xf32>
    %41 = arith.subf %25, %40 : vector<2x4x8x1xf32>
    %42 = math.exp %41 : vector<2x4x8x1xf32>
    %43 = vector.shape_cast %34 : vector<1x1xf32> to vector<1x1x1xf32>
    %44 = vector.broadcast %43 : vector<1x1x1xf32> to vector<2x8x1xf32>
    %45 = arith.subf %44, %38 : vector<2x8x1xf32>
    %46 = math.exp %45 : vector<2x8x1xf32>
    %cst_17 = arith.constant dense<0.000000e+00> : vector<2x8x1xf32>
    %47 = vector.multi_reduction <add>, %42, %cst_17 [1] : vector<2x4x8x1xf32> to vector<2x8x1xf32>
    %48 = arith.addf %47, %46 : vector<2x8x1xf32>
    %49 = tpu.reciprocal %48 {approx = true} : vector<2x8x1xf32> -> vector<2x8x1xf32>
    %50 = arith.mulf %48, %49 : vector<2x8x1xf32>
    %cst_18 = arith.constant 2.000000e+00 : f32
    %51 = vector.broadcast %cst_18 : f32 to vector<2x8x1xf32>
    %52 = arith.subf %51, %50 : vector<2x8x1xf32>
    %53 = arith.mulf %49, %52 : vector<2x8x1xf32>
    %54 = vector.shape_cast %53 : vector<2x8x1xf32> to vector<2x1x8x1xf32>
    %55 = vector.broadcast %54 : vector<2x1x8x1xf32> to vector<2x4x8x1xf32>
    %56 = arith.mulf %42, %55 : vector<2x4x8x1xf32>
    %57 = arith.mulf %46, %53 : vector<2x8x1xf32>
    %cst_19 = arith.constant 1.000000e+00 : f32
    %58 = vector.broadcast %cst_19 : f32 to vector<2x8x1xf32>
    %59 = arith.subf %58, %57 : vector<2x8x1xf32>
    %60 = vector.broadcast %56 : vector<2x4x8x1xf32> to vector<2x4x8x32xf32>
    %61 = arith.mulf %60, %1 : vector<2x4x8x32xf32>
    %cst_20 = arith.constant dense<0.000000e+00> : vector<2x8x32xf32>
    %62 = vector.multi_reduction <add>, %61, %cst_20 [1] : vector<2x4x8x32xf32> to vector<2x8x32xf32>
    %63 = vector.shape_cast %6 : vector<1x32xf32> to vector<1x1x32xf32>
    %64 = vector.broadcast %57 : vector<2x8x1xf32> to vector<2x8x32xf32>
    %65 = vector.broadcast %63 : vector<1x1x32xf32> to vector<2x8x32xf32>
    %66 = arith.mulf %64, %65 : vector<2x8x32xf32>
    %67 = arith.addf %62, %66 : vector<2x8x32xf32>
    %68 = vector.broadcast %59 : vector<2x8x1xf32> to vector<2x8x32xf32>
    %69 = arith.mulf %68, %3 : vector<2x8x32xf32>
    %70 = vector.shape_cast %7 : vector<1x32xf32> to vector<1x1x32xf32>
    %71 = vector.broadcast %57 : vector<2x8x1xf32> to vector<2x8x32xf32>
    %72 = vector.broadcast %70 : vector<1x1x32xf32> to vector<2x8x32xf32>
    %73 = arith.mulf %71, %72 : vector<2x8x32xf32>
    %74 = arith.addf %69, %73 : vector<2x8x32xf32>
    %cst_21 = arith.constant 0.000000e+00 : f32
    %75 = vector.broadcast %cst_21 : f32 to vector<2x8x32xf32>
    %76 = arith.maximumf %67, %75 : vector<2x8x32xf32>
    %77 = vector.shape_cast %76 : vector<2x8x32xf32> to vector<16x32xf32>
    %c0_22 = arith.constant 0 : index
    %c0_23 = arith.constant 0 : index
    %78 = vector.load %arg11[%c0_22, %c0_23] : memref<16x64xf32, #tpu.memory_space<vmem>>, vector<16x32xf32>
    tpu.vector_store %arg11[%c0_22, %c0_23], %77 {strides = array<i32>} : memref<16x64xf32, #tpu.memory_space<vmem>>, vector<16x32xf32>,
    %cst_24 = arith.constant 0.000000e+00 : f32
    %79 = vector.broadcast %cst_24 : f32 to vector<2x8x32xf32>
    %80 = arith.maximumf %74, %79 : vector<2x8x32xf32>
    %81 = vector.shape_cast %80 : vector<2x8x32xf32> to vector<16x32xf32>
    %c0_25 = arith.constant 0 : index
    %c32 = arith.constant 32 : index
    %82 = vector.load %arg11[%c0_25, %c32] : memref<16x64xf32, #tpu.memory_space<vmem>>, vector<16x32xf32>
    tpu.vector_store %arg11[%c0_25, %c32], %81 {strides = array<i32>} : memref<16x64xf32, #tpu.memory_space<vmem>>, vector<16x32xf32>,
    %c0_26 = arith.constant 0 : index
    %c0_27 = arith.constant 0 : index
    %83 = vector.load %arg11[%c0_26, %c0_27] : memref<16x64xf32, #tpu.memory_space<vmem>>, vector<16x64xf32>
    %c0_28 = arith.constant 0 : index
    %c0_29 = arith.constant 0 : index
    %84 = vector.load %arg5[%c0_28, %c0_29] : memref<64x32xf32, #tpu.memory_space<vmem>>, vector<64x32xf32>
    %cst_30 = arith.constant dense<0.000000e+00> : vector<16x32xf32>
    %85 = tpu.matmul %83, %84, %cst_30 {dimension_numbers = #tpu.dot_dimension_numbers<[1], [0], [0], [1], [0, 0, 1, 1], [], []>} : vector<16x64xf32>, vector<64x32xf32>, vector<16x32xf32> -> vector<16x32xf32>
    %c0_31 = arith.constant 0 : index
    %c0_32 = arith.constant 0 : index
    %86 = vector.load %arg6[%c0_31, %c0_32] : memref<1x32xf32, #tpu.memory_space<vmem>>, vector<1x32xf32>
    %87 = vector.broadcast %86 : vector<1x32xf32> to vector<16x32xf32>
    %88 = arith.addf %85, %87 : vector<16x32xf32>
    %89 = vector.shape_cast %88 : vector<16x32xf32> to vector<2x8x32xf32>
    %90 = arith.addf %89, %3 : vector<2x8x32xf32>
    %91 = vector.shape_cast %90 : vector<2x8x32xf32> to vector<2x256xf32>
    %cst_33 = arith.constant dense<0.000000e+00> : vector<256xf32>
    %92 = vector.multi_reduction <add>, %91, %cst_33 [0] : vector<2x256xf32> to vector<256xf32>
    %93 = vector.shape_cast %92 : vector<256xf32> to vector<1x256xf32>
    %cst_34 = arith.constant 2.000000e+00 : f32
    %94 = vector.broadcast %cst_34 : f32 to vector<1x256xf32>
    %95 = arith.divf %93, %94 : vector<1x256xf32>
    %96 = vector.broadcast %95 : vector<1x256xf32> to vector<2x256xf32>
    %97 = arith.subf %91, %96 : vector<2x256xf32>
    %98 = arith.mulf %97, %97 : vector<2x256xf32>
    %cst_35 = arith.constant dense<0.000000e+00> : vector<256xf32>
    %99 = vector.multi_reduction <add>, %98, %cst_35 [0] : vector<2x256xf32> to vector<256xf32>
    %100 = vector.shape_cast %99 : vector<256xf32> to vector<1x256xf32>
    %cst_36 = arith.constant 2.000000e+00 : f32
    %101 = vector.broadcast %cst_36 : f32 to vector<1x256xf32>
    %102 = arith.divf %100, %101 : vector<1x256xf32>
    %c0_37 = arith.constant 0 : index
    %c0_38 = arith.constant 0 : index
    %103 = vector.load %arg7[%c0_37, %c0_38] : memref<1x256xf32, #tpu.memory_space<vmem>>, vector<1x256xf32>
    %cst_39 = arith.constant 9.99999974E-6 : f32
    %104 = vector.broadcast %cst_39 : f32 to vector<1x256xf32>
    %105 = arith.addf %102, %104 : vector<1x256xf32>
    %106 = math.rsqrt %105 : vector<1x256xf32>
    %107 = arith.mulf %103, %106 : vector<1x256xf32>
    %c0_40 = arith.constant 0 : index
    %c0_41 = arith.constant 0 : index
    %108 = vector.load %arg8[%c0_40, %c0_41] : memref<1x256xf32, #tpu.memory_space<vmem>>, vector<1x256xf32>
    %109 = arith.mulf %95, %107 : vector<1x256xf32>
    %110 = arith.subf %108, %109 : vector<1x256xf32>
    %111 = vector.broadcast %107 : vector<1x256xf32> to vector<2x256xf32>
    %112 = arith.mulf %91, %111 : vector<2x256xf32>
    %113 = vector.broadcast %110 : vector<1x256xf32> to vector<2x256xf32>
    %114 = arith.addf %112, %113 : vector<2x256xf32>
    %c0_42 = arith.constant 0 : index
    %c0_43 = arith.constant 0 : index
    %115 = vector.load %arg10[%c0_42, %c0_43] : memref<2x256xf32, #tpu.memory_space<vmem>>, vector<2x256xf32>
    tpu.vector_store %arg10[%c0_42, %c0_43], %114 {strides = array<i32>} : memref<2x256xf32, #tpu.memory_space<vmem>>, vector<2x256xf32>,
    return
  }
}

</mosaic_0001>

<bundles_post_ra>
// kernel: user_info_mixing.1
= control target key start
LH: loop header
LB: loop body
LE: loop exit
PB: predicated region body
PF: predicated region fallthrough
CT: control target
= control target key end

     0   :  { %vm62_vm0 = vcmask 261120   ;;  %vm120_vm1 = vcmask 253952   ;;  %vm245_vm2 = vcmask 523520   ;;  %vm262_vm3 = vcmask 523264   ;;  %s791_s0 = inlined_call_operand.vmem [shape: f32[2,5,8,32], index: 0, kind: input, shape index: {}]   ;;  %s792_s2 = inlined_call_operand.vmem [shape: f32[1,32], index: 2, kind: input, shape index: {}]   ;;  %s793_s1 = inlined_call_operand.vmem [shape: f32[1,32], index: 1, kind: input, shape index: {}]   ;;  %s794_s3 = inlined_call_operand.vmem [shape: f32[1,32], index: 3, kind: input, shape index: {}]   ;;  %s795_s4 = inlined_call_operand.vmem [shape: f32[1,32], index: 4, kind: input, shape index: {}]   ;;  %s796_s9 = inlined_call_operand.<no memory space> [shape: f32[1], index: 9, kind: input, shape index: {}]   ;;  %s797_s5 = inlined_call_operand.vmem [shape: f32[64,32], index: 5, kind: input, shape index: {}]   ;;  %s798_s6 = inlined_call_operand.vmem [shape: f32[1,32], index: 6, kind: input, shape index: {}]   ;;  %s799_s7 = inlined_call_operand.vmem [shape: f32[1,256], index: 7, kind: input, shape index: {}]   ;;  %s800_s8 = inlined_call_operand.vmem [shape: f32[1,256], index: 8, kind: input, shape index: {}]   ;;  %s801_s10 = inlined_call_operand.vmem [shape: f32[2,256], index: 10, kind: output, shape index: {}]  }
   0x1   :  { %v600_v0 = vld [vmem:[%s791_s0 + $0x48] sm:$0xff]  ;;  %v501_v1 = vld [vmem:[%s792_s2] ss:$0 sm:$0xff]  ;;  %v617_v5 = vld [vmem:[%s791_s0 + $0x30] sm:$0xff]  ;;  %v98_v46 = vstv %s796_s9  ;;  %vm295_vm4 = vcmask 1047556   ;;  %vm373_vm5 = vcmask 785408  }
   0x2   :  { %v608_v2 = vld [vmem:[%s791_s0 + $0x40] sm:$0xff]  ;;  %v91_v4 = vmul.f32 %v501_v1, %v600_v0  ;;  %v624_v8 = vld [vmem:[%s791_s0 + $0x28] sm:$0xff]  ;;  %v630_v10 = vld [vmem:[%s791_s0 + $0x38] sm:$0xff]  ;;  %vm378_vm6 = vcmask 1041408   ;;  %vm448_vm12 = vcmask 1040384  }
   0x3   :  { %v502_v3 = vld [vmem:[%s793_s1] ss:$0 sm:$0xff]  ;;  %v653_v21 = vld [vmem:[%s791_s0 + $0x10] sm:$0xff]  ;;  %v658_v22 = vld [vmem:[%s791_s0 + $0x8] sm:$0xff] }
   0x4   :  { %v61_v6 = vmul.f32 %v502_v3, %v608_v2  ;;  %v59_v7 = vmul.f32 %v502_v3, %v617_v5  ;;  %v95_v9 = vsel %vm62_vm0, %v91_v4, 0.0  ;;  %v635_v11 = vld [vmem:[%s791_s0 + $0x20] sm:$0xff]  ;;  %v58_v14 = vmul.f32 %v502_v3, %v624_v8  ;;  %v681_v35 = vld [vmem:[%s791_s0 + $0x18] sm:$0xff] }
   0x5   :  { %96 = vadd.xlane.f32.xlu0 %v95_v9  ;;  %v60_v15 = vmul.f32 %v502_v3, %v630_v10  ;;  %v90_v16 = vmul.f32 %v501_v1, %v635_v11  ;;  %v648_v20 = vld [vmem:[%s791_s0] sm:$0xff]  ;;  %v56_v25 = vmul.f32 %v502_v3, %v653_v21  ;;  %v55_v26 = vmul.f32 %v502_v3, %v658_v22 }
   0x6   :  { %v84_v12 = vsel %vm62_vm0, %v61_v6, 0.0  ;;  %v78_v13 = vsel %vm62_vm0, %v59_v7, 0.0  ;;  %v75_v17 = vsel %vm62_vm0, %v58_v14, 0.0  ;;  %v54_v23 = vmul.f32 %v502_v3, %v648_v20  ;;  %v47_v24 = vld [vmem:[%s792_s2] sm:$0x1] }
   0x7   :  { %85 = vadd.xlane.f32.xlu2 %v84_v12  ;;  %79 = vadd.xlane.f32.xlu1 %v78_v13  ;;  %v81_v18 = vsel %vm62_vm0, %v60_v15, 0.0  ;;  %v92_v19 = vsel %vm62_vm0, %v90_v16, 0.0  ;;  %v46_v27 = vld [vmem:[%s793_s1] sm:$0x1]  ;;  %v69_v31 = vsel %vm62_vm0, %v56_v25, 0.0  ;;  %v66_v32 = vsel %vm62_vm0, %v55_v26, 0.0 }
   0x8   :  { %v48_v28 = vld [vmem:[%s794_s3] sm:$0x1]  ;;  %v63_v30 = vsel %vm62_vm0, %v54_v23, 0.0  ;;  %v57_v36 = vmul.f32 %v502_v3, %v681_v35 }
   0x9   :  { %v49_v29 = vld [vmem:[%s795_s4] sm:$0x1]  ;;  %v117_v33 = vmul.f32 %v48_v28, %v46_v27 }
   0xa   :  { %v118_v34 = vmul.f32 %v49_v29, %v47_v24  ;;  %v72_v38 = vsel %vm62_vm0, %v57_v36, 0.0 }
   0xc   :  { %v119_v37 = vadd.f32 %v118_v34, %v117_v33 }
   0xd   :  { %76 = vadd.xlane.f32.xlu0 %v75_v17 }
   0xe   :  { %v121_v39 = vsel %vm120_vm1, %v119_v37, 0.0 }
   0xf   :  { %82 = vadd.xlane.f32.xlu1 %v81_v18  ;;  %93 = vadd.xlane.f32.xlu2 %v92_v19 }
  0x15   :  { %64 = vadd.xlane.f32.xlu0 %v63_v30 }
  0x17   :  { %70 = vadd.xlane.f32.xlu2 %v69_v31  ;;  %67 = vadd.xlane.f32.xlu1 %v66_v32 }
  0x1d   :  { %73 = vadd.xlane.f32.xlu0 %v72_v38 }
  0x1f   :  { %122 = vadd.xlane.f32.xlu1 %v121_v39 }
  0x78   :  { %v97_v40 = vpop.xlane.xlu0 %96 }
  0x79   :  { %v100_v47 = vadd.f32 %v98_v46, %v97_v40 }
  0x7a   :  { %v86_v41 = vpop.xlane.xlu2 %85  ;;  %v80_v42 = vpop.xlane.xlu1 %79 }
  0x7b   :  { %v108_v54 = vadd.f32 %v100_v47, %v86_v41  ;;  %v106_v55 = vadd.f32 %v100_v47, %v80_v42 }
  0x7d   :  { %v116_v61 = vmax.f32 %v108_v54, 0.0  ;;  %v114_v62 = vmax.f32 %v106_v55, 0.0 }
  0x7f   :  { %v130_v14 = vmax.f32 %v114_v62, %v116_v61 }
  0x80   :  { %v77_v43 = vpop.xlane.xlu0 %76 }
  0x81   :  { %v105_v52 = vadd.f32 %v100_v47, %v77_v43 }
  0x82   :  { %v83_v44 = vpop.xlane.xlu1 %82  ;;  %v94_v45 = vpop.xlane.xlu2 %93 }
  0x83   :  { %v99_v49 = vadd.f32 %v98_v46, %v94_v45  ;;  %v107_v51 = vadd.f32 %v100_v47, %v83_v44  ;;  %v113_v59 = vmax.f32 %v105_v52, 0.0 }
  0x85   :  { %v115_v58 = vmax.f32 %v107_v51, 0.0 }
  0x87   :  { %v129_v7 = vmax.f32 %v113_v59, %v115_v58 }
  0x88   :  { %v65_v48 = vpop.xlane.xlu0 %64 }
  0x89   :  { %v101_v57 = vadd.f32 %v99_v49, %v65_v48  ;;  %v131_v18 = vmax.f32 %v129_v7, %v130_v14 }
  0x8a   :  { %v68_v50 = vpop.xlane.xlu1 %67  ;;  %v71_v53 = vpop.xlane.xlu2 %70 }
  0x8b   :  { %v103_v56 = vadd.f32 %v99_v49, %v71_v53  ;;  %v102_v60 = vadd.f32 %v99_v49, %v68_v50  ;;  %v109_v3 = vmax.f32 %v101_v57, 0.0  ;;  %v256_v57 = vld [vmem:[%s797_s5 + $0x30] sm:$0xff] }
  0x8d   :  { %v111_v1 = vmax.f32 %v103_v56, 0.0  ;;  %v110_v12 = vmax.f32 %v102_v60, 0.0  ;;  %v257_v56 = vld [vmem:[%s797_s5 + $0x38] sm:$0xff] }
  0x8e   :  { %487 = vmatpush.msra.mxu1 %v257_v56  ;;  %277 = vmatpush.msra.mxu0 %v257_v56 }
  0x8f   :  { %v126_v16 = vmax.f32 %v109_v3, %v111_v1 }
  0x90   :  { %v74_v63 = vpop.xlane.xlu0 %73  ;;  %488 = vmatpush.msra.mxu1 %v256_v57  ;;  %278 = vmatpush.msra.mxu0 %v256_v57 }
  0x91   :  { %v104_v6 = vadd.f32 %v99_v49, %v74_v63 }
  0x92   :  { %v123_v4 = vpop.xlane.xlu1 %122 }
  0x93   :  { %v124_v9 = vadd.f32 %v123_v4, %v98_v46  ;;  %v112_v13 = vmax.f32 %v104_v6, 0.0 }
  0x95   :  { %v125_v15 = vmax.f32 %v124_v9, 0.0  ;;  %v127_v17 = vmax.f32 %v110_v12, %v112_v13 }
  0x97   :  { %v132_v19 = vperm.slane %v125_v15, 0  ;;  %v128_v23 = vmax.f32 %v126_v16, %v127_v17  ;;  %v504_v17 = vld [vmem:[%s795_s4] ss:$0 sm:$0xff] }
  0x99   :  { %v134_v24 = vmax.f32 %v131_v18, %v132_v19  ;;  %v133_v25 = vmax.f32 %v128_v23, %v132_v19 }
  0x9b   :  { %v139_v26 = vsub.f32 %v113_v59, %v134_v24  ;;  %v140_v27 = vsub.f32 %v114_v62, %v134_v24  ;;  %v141_v28 = vsub.f32 %v115_v58, %v134_v24  ;;  %v142_v29 = vsub.f32 %v116_v61, %v134_v24  ;;  %v255_v62 = vld [vmem:[%s797_s5 + $0x28] sm:$0xff] }
  0x9c   :  { %v135_v30 = vsub.f32 %v109_v3, %v133_v25  ;;  %v136_v33 = vsub.f32 %v110_v12, %v133_v25  ;;  %v160_v36 = vsub.f32 %v132_v19, %v134_v24  ;;  %v137_v38 = vsub.f32 %v111_v1, %v133_v25  ;;  %v254_v3 = vld [vmem:[%s797_s5 + $0x20] sm:$0xff]  ;;  %489 = vmatpush.msra.mxu1 %v255_v62 }
  0x9d   :  { %v151_v31 = vmul.f32 1.442695, %v139_v26  ;;  %v153_v32 = vmul.f32 1.442695, %v140_v27  ;;  %v155_v34 = vmul.f32 1.442695, %v141_v28  ;;  %v138_v40 = vsub.f32 %v112_v13, %v133_v25  ;;  %279 = vmatpush.msra.mxu0 %v255_v62 }
  0x9e   :  { %v157_v37 = vmul.f32 1.442695, %v142_v29  ;;  %v143_v39 = vmul.f32 1.442695, %v135_v30  ;;  %v145_v41 = vmul.f32 1.442695, %v136_v33  ;;  %v159_v44 = vsub.f32 %v132_v19, %v133_v25  ;;  %490 = vmatpush.msra.mxu1 %v254_v3 }
  0x9f   :  { %506 = vpow2.f32 %v151_v31  ;;  %v163_v42 = vmul.f32 1.442695, %v160_v36  ;;  %v147_v43 = vmul.f32 1.442695, %v137_v38  ;;  %v149_v46 = vmul.f32 1.442695, %v138_v40  ;;  %280 = vmatpush.msra.mxu0 %v254_v3 }
  0xa0   :  { %508 = vpow2.f32 %v153_v32  ;;  %v161_v49 = vmul.f32 1.442695, %v159_v44 }
  0xa1   :  { %510 = vpow2.f32 %v155_v34 }
  0xa2   :  { %512 = vpow2.f32 %v157_v37 }
  0xa3   :  { %514 = vpow2.f32 %v143_v39  ;;  %v503_v39 = vld [vmem:[%s794_s3] ss:$0 sm:$0xff]  ;;  %s536_s3 = smov 32  }
  0xa4   :  { %516 = vpow2.f32 %v145_v41 }
  0xa5   :  { %v507_v45 = vpop.eup %506  ;;  %518 = vpow2.f32 %v163_v42 }
  0xa6   :  { %v509_v47 = vpop.eup %508  ;;  %520 = vpow2.f32 %v147_v43 }
  0xa7   :  { %v168_v48 = vadd.f32 %v509_v47, %v507_v45  ;;  %v511_v50 = vpop.eup %510  ;;  %522 = vpow2.f32 %v149_v46 }
  0xa8   :  { %v513_v51 = vpop.eup %512  ;;  %524 = vpow2.f32 %v161_v49 }
  0xa9   :  { %v169_v52 = vadd.f32 %v511_v50, %v168_v48  ;;  %v515_v53 = vpop.eup %514 }
  0xaa   :  { %v517_v54 = vpop.eup %516 }
  0xab   :  { %v170_v55 = vadd.f32 %v513_v51, %v169_v52  ;;  %v519_v58 = vpop.eup %518  ;;  %v165_v59 = vadd.f32 %v517_v54, %v515_v53 }
  0xac   :  { %v521_v60 = vpop.eup %520 }
  0xad   :  { %v172_v61 = vadd.f32 %v519_v58, %v170_v55  ;;  %v166_v63 = vadd.f32 %v521_v60, %v165_v59  ;;  %v523_v1 = vpop.eup %522 }
  0xae   :  { %v525_v6 = vpop.eup %524 }
  0xaf   :  { %526 = vrcp.f32 %v172_v61  ;;  %v167_v4 = vadd.f32 %v523_v1, %v166_v63 }
  0xb1   :  { %v171_v7 = vadd.f32 %v525_v6, %v167_v4  ;;  %v252_v4 = vld [vmem:[%s797_s5 + $0x10] sm:$0xff] }
  0xb3   :  { %528 = vrcp.f32 %v171_v7 }
  0xb5   :  { %v527_v9 = vpop.eup %526 }
  0xb6   :  { %v176_v12 = vmul.f32 %v527_v9, %v172_v61 }
  0xb8   :  { %v178_v13 = vsub.f32 2.0, %v176_v12 }
  0xb9   :  { %v529_v14 = vpop.eup %528 }
  0xba   :  { %v180_v15 = vmul.f32 %v527_v9, %v178_v13  ;;  %v175_v16 = vmul.f32 %v529_v14, %v171_v7  ;;  %v250_v7 = vld [vmem:[%s797_s5] sm:$0xff] }
  0xbc   :  { %v190_v18 = vmul.f32 %v519_v58, %v180_v15  ;;  %v185_v19 = vmul.f32 %v507_v45, %v180_v15  ;;  %v186_v23 = vmul.f32 %v509_v47, %v180_v15  ;;  %v187_v24 = vmul.f32 %v511_v50, %v180_v15 }
  0xbd   :  { %v177_v25 = vsub.f32 2.0, %v175_v16  ;;  %v188_v26 = vmul.f32 %v513_v51, %v180_v15  ;;  %v505_v15 = vld [vmem:[%s798_s6] ss:$0 sm:$0xff]  ;;  %s540_s6 = smov 96  }
  0xbe   :  { %v192_v27 = vsub.f32 1.0, %v190_v18  ;;  %v197_v28 = vmul.f32 %v185_v19, %v624_v8  ;;  %v198_v30 = vmul.f32 %v186_v23, %v617_v5  ;;  %v199_v31 = vmul.f32 %v187_v24, %v630_v10 }
  0xbf   :  { %v179_v29 = vmul.f32 %v529_v14, %v177_v25  ;;  %v228_v33 = vmul.f32 %v504_v17, %v190_v18  ;;  %v200_v37 = vmul.f32 %v188_v26, %v608_v2  ;;  %v219_v51 = vmul.f32 %v503_v39, %v190_v18 }
  0xc0   :  { %v223_v32 = vmul.f32 %v192_v27, %v600_v0  ;;  %v208_v34 = vsel %vm62_vm0, %v197_v28, 0.0  ;;  %v209_v38 = vsel %vm62_vm0, %v198_v30, 0.0  ;;  %v211_v10 = vsel %vm62_vm0, %v199_v31, 0.0 }
  0xc1   :  { %v189_v36 = vmul.f32 %v525_v6, %v179_v29  ;;  %v210_v40 = vadd.f32 %v209_v38, %v208_v34  ;;  %v181_v41 = vmul.f32 %v515_v53, %v179_v29  ;;  %v184_v5 = vmul.f32 %v523_v1, %v179_v29  ;;  %v251_v6 = vld [vmem:[%s797_s5 + $0x8] sm:$0xff] }
  0xc2   :  { %v230_v8 = vadd.f32 %v228_v33, %v223_v32  ;;  %v182_v43 = vmul.f32 %v517_v54, %v179_v29  ;;  %v183_v46 = vmul.f32 %v521_v60, %v179_v29  ;;  %v213_v49 = vsel %vm62_vm0, %v200_v37, 0.0 }
  0xc3   :  { %v191_v42 = vsub.f32 1.0, %v189_v36  ;;  %v212_v45 = vadd.f32 %v211_v10, %v210_v40  ;;  %v193_v47 = vmul.f32 %v181_v41, %v648_v20  ;;  %v227_v48 = vmul.f32 %v504_v17, %v189_v36 }
  0xc4   :  { %v236_v44 = vmax.f32 %v230_v8, 0.0  ;;  %v194_v50 = vmul.f32 %v182_v43, %v658_v22  ;;  %v195_v53 = vmul.f32 %v183_v46, %v653_v21  ;;  %v196_v56 = vmul.f32 %v184_v5, %v681_v35  ;;  %v253_v35 = vld [vmem:[%s797_s5 + $0x18] sm:$0xff]  ;;  %s539_s5 = smov 64  }
  0xc5   :  { %v222_v2 = vmul.f32 %v191_v42, %v635_v11  ;;  %v214_v52 = vadd.f32 %v213_v49, %v212_v45  ;;  %v201_v54 = vsel %vm62_vm0, %v193_v47, 0.0  ;;  %v218_v21 = vmul.f32 %v503_v39, %v189_v36  ;;  %491 = vmatpush.msra.mxu1 %v253_v35  ;;  %281 = vmatpush.msra.mxu0 %v253_v35 }
  0xc6   :  { %241 = vrot.lane.b32.xlu2 %v236_v44, %s536_s3  ;;  %v202_v20 = vsel %vm62_vm0, %v194_v50, 0.0  ;;  %v204_v60 = vsel %vm62_vm0, %v195_v53, 0.0  ;;  %v206_v62 = vsel %vm62_vm0, %v196_v56, 0.0  ;;  %v537_v19 = vmov 1983009808  }
  0xc7   :  { %v229_v55 = vadd.f32 %v227_v48, %v222_v2  ;;  %v221_v57 = vadd.f32 %v219_v51, %v214_v52  ;;  %v203_v58 = vadd.f32 %v202_v20, %v201_v54  ;;  %492 = vmatpush.msra.mxu1 %v252_v4  ;;  %282 = vmatpush.msra.mxu0 %v252_v4  ;;  %v298_v23 = vunpack.c.l.s4 %v537_v19 }
  0xc8   :  { %v538_v27 = vmov 1934713408   ;;  %v541_v54 = vmov 2.0  }
  0xc9   :  { %v235_v59 = vmax.f32 %v229_v55, 0.0  ;;  %v232_v22 = vmax.f32 %v221_v57, 0.0  ;;  %v205_v61 = vadd.f32 %v204_v60, %v203_v58  ;;  %493 = vmatpush.msra.mxu1 %v251_v6  ;;  %283 = vmatpush.msra.mxu0 %v251_v6  ;;  %v299_v24 = vunpack.c.0.s8 %v298_v23 }
  0xca   :  { %v320_v28 = vunpack.c.l.s4 %v538_v27  ;;  %530 = vrcp.f32 %v541_v54 }
  0xcb   :  { %239 = vrot.lane.b32.xlu0 %v235_v59, %s536_s3  ;;  %234 = vst.msk [vmem:[#allocation2 + $0x8] sm:$0xff] %vm62_vm0, %v232_v22  ;;  %v207_v63 = vadd.f32 %v206_v62, %v205_v61  ;;  %494 = vmatpush.msra.mxu1 %v250_v7 }
  0xcc   :  { %284 = vmatpush.msra.mxu0 %v250_v7  ;;  %v321_v34 = vunpack.c.0.s8 %v320_v28 }
  0xcd   :  { %v220_v1 = vadd.f32 %v218_v21, %v207_v63 }
  0xcf   :  { %v231_v3 = vmax.f32 %v220_v1, 0.0 }
  0xd0   :  { %v531_v56 = vpop.eup %530 }
  0xd1   :  { %233 = vst.msk [vmem:[#allocation2] sm:$0xff] %vm62_vm0, %v231_v3  ;;  %v394_v20 = vmul.f32 2.0, %v531_v56  ;;  %vm398_vm7 = vweird.f32 %v531_v56 }
  0xd3   :  { %v395_v22 = vsub.f32 1.0, %v394_v20 }
  0xd5   :  { %v396_v1 = vmul.f32 %v531_v56, %v395_v22 }
 0x120   :  { %v242_v9 = vpop.permute.xlu2 %241 }
 0x121   :  { %247 = vst.msk [vmem:[#allocation2 + $0x8] sm:$0xff] %vm245_vm2, %v242_v9 }
 0x128   :  { %v249_v12 = vld [vmem:[#allocation2 + $0x8] sm:$0xff] }
 0x129   :  { %486 = vmatmul.msk.f32.vlgmr.msra.gmra.mxu1 %vm262_vm3, %v249_v12  ;;  %v397_v12 = vadd.f32 %v531_v56, %v396_v1 }
 0x13d   :  { %v240_v13 = vpop.permute.xlu0 %239 }
 0x13e   :  { %246 = vst.msk [vmem:[#allocation2] sm:$0xff] %vm245_vm2, %v240_v13 }
 0x145   :  { %v248_v14 = vld [vmem:[#allocation2] sm:$0xff] }
 0x146   :  { %485 = vmatmul.msk.f32.vlgmr.msra.gmra.mxu0 %vm262_vm3, %v248_v14 }
 0x1a6   :  { %v289_v16 = vpop.f32.mrf.mxu1 }
 0x1a7   :  { %v290_v17 = vadd.f32 %v505_v15, %v289_v16 }
 0x1a9   :  { %v293_v18 = vadd.f32 %v290_v17, %v600_v0 }
 0x1ab   :  { %v305_v25 = vrot.slane %v293_v18, 4  ;;  %v310_v30 = vperm.slane %v293_v18, %v299_v24  ;;  %v399_v18 = vsel %vm398_vm7, %v531_v56, %v397_v12 }
 0x1ad   :  { %v306_v29 = vsel %vm295_vm4, 0.0, %v305_v25  ;;  %v315_v36 = vrot.slane %v310_v30, 4 }
 0x1ae   :  { %v314_v33 = vperm.slane %v306_v29, %v299_v24 }
 0x1b0   :  { %v327_v40 = vrot.slane %v314_v33, 4 }
 0x1c3   :  { %v286_v26 = vpop.f32.mrf.mxu0 }
 0x1c4   :  { %v287_v31 = vadd.f32 %v505_v15, %v286_v26 }
 0x1c6   :  { %v292_v32 = vadd.f32 %v287_v31, %v635_v11 }
 0x1c8   :  { %v294_v37 = vrot.slane %v292_v32, 4  ;;  %v300_v38 = vperm.slane %v292_v32, %v299_v24 }
 0x1ca   :  { %v296_v0 = vsel %vm295_vm4, 0.0, %v294_v37  ;;  %v317_v39 = vrot.slane %v300_v38, 4  ;;  %v316_v8 = vsel %vm295_vm4, %v315_v36, %v300_v38 }
 0x1cb   :  { %v304_v41 = vperm.slane %v296_v0, %v299_v24  ;;  %v322_v5 = vperm.slane %v316_v8, %v321_v34 }
 0x1cc   :  { %v318_v42 = vsel %vm295_vm4, %v310_v30, %v317_v39 }
 0x1cd   :  { %v339_v10 = vrot.slane %v322_v5, 4  ;;  %v329_v43 = vrot.slane %v304_v41, 4  ;;  %v328_v44 = vsel %vm295_vm4, %v327_v40, %v304_v41  ;;  %v326_v47 = vperm.slane %v318_v42, %v321_v34 }
 0x1ce   :  { %v334_v11 = vperm.slane %v328_v44, %v321_v34 }
 0x1cf   :  { %v340_v45 = vsel %vm295_vm4, 0.0, %v339_v10  ;;  %v330_v46 = vsel %vm295_vm4, %v314_v33, %v329_v43  ;;  %v341_v50 = vrot.slane %v326_v47, 4 }
 0x1d0   :  { %348 = vrot.lane.b32.xlu0 %v340_v45, %s536_s3  ;;  %v338_v2 = vperm.slane %v330_v46, %v321_v34  ;;  %v343_v48 = vrot.slane %v334_v11, 4 }
 0x1d1   :  { %v342_v52 = vsel %vm295_vm4, 0.0, %v341_v50 }
 0x1d2   :  { %364 = vrot.lane.b32.xlu2 %v338_v2, %s539_s5  ;;  %v344_v49 = vsel %vm295_vm4, 0.0, %v343_v48  ;;  %v345_v51 = vrot.slane %v338_v2, 4 }
 0x1d3   :  { %360 = vrot.lane.b32.xlu1 %v344_v49, %s536_s3 }
 0x1d4   :  { %v346_v53 = vsel %vm295_vm4, 0.0, %v345_v51 }
 0x1d8   :  { %356 = vrot.lane.b32.xlu0 %v342_v52, %s540_s6 }
 0x1da   :  { %368 = vrot.lane.b32.xlu2 %v346_v53, %s540_s6 }
 0x1db   :  { %352 = vrot.lane.b32.xlu1 %v326_v47, %s539_s5 }
 0x22c   :  { %v365_v55 = vpop.permute.xlu2 %364 }
 0x234   :  { %v369_v60 = vpop.permute.xlu2 %368 }
 0x242   :  { %v349_v57 = vpop.permute.xlu0 %348 }
 0x243   :  { %v371_v35 = vsel %vm62_vm0, %v322_v5, %v349_v57 }
 0x245   :  { %v361_v58 = vpop.permute.xlu1 %360 }
 0x246   :  { %v375_v59 = vsel %vm62_vm0, %v334_v11, %v361_v58 }
 0x247   :  { %v376_v61 = vsel %vm262_vm3, %v375_v59, %v365_v55  ;;  %v422_v59 = vld [vmem:[%s799_s7] sm:$0x3] }
 0x248   :  { %v762_v62 = vsel %vm373_vm5, %v376_v61, %v369_v60 }
 0x249   :  { %v386_v21 = vsel %vm378_vm6, %v762_v62, 0.0 }
 0x24a   :  { %v387_v63 = vrot.slane %v386_v21, 4  ;;  %v357_v7 = vpop.permute.xlu0 %356 }
 0x24c   :  { %v388_v3 = vadd.f32 %v387_v63, %v386_v21 }
 0x24d   :  { %v353_v4 = vpop.permute.xlu1 %352 }
 0x24e   :  { %v389_v6 = vrot.slane %v388_v3, 2  ;;  %v372_v9 = vsel %vm262_vm3, %v371_v35, %v353_v4  ;;  %v452_v35 = vld [vmem:[%s800_s8] sm:$0x3] }
 0x24f   :  { %v769_v13 = vsel %vm373_vm5, %v372_v9, %v357_v7 }
 0x250   :  { %v390_v14 = vadd.f32 %v389_v6, %v388_v3  ;;  %v379_v15 = vsel %vm378_vm6, %v769_v13, 0.0 }
 0x251   :  { %v380_v16 = vrot.slane %v379_v15, 4 }
 0x252   :  { %v391_v17 = vrot.slane %v390_v14, 1 }
 0x253   :  { %v381_v19 = vadd.f32 %v380_v16, %v379_v15 }
 0x254   :  { %v392_v23 = vadd.f32 %v391_v17, %v390_v14 }
 0x255   :  { %v382_v24 = vrot.slane %v381_v19, 2 }
 0x256   :  { %v401_v25 = vmul.f32 %v399_v18, %v392_v23 }
 0x257   :  { %v383_v26 = vadd.f32 %v382_v24, %v381_v19 }
 0x258   :  { %v403_v27 = vsub.f32 %v762_v62, %v401_v25 }
 0x259   :  { %v384_v28 = vrot.slane %v383_v26, 1 }
 0x25a   :  { %v405_v29 = vmul.f32 %v403_v27, %v403_v27 }
 0x25b   :  { %v385_v30 = vadd.f32 %v384_v28, %v383_v26 }
 0x25c   :  { %v413_v31 = vsel %vm378_vm6, %v405_v29, 0.0 }
 0x25d   :  { %v414_v32 = vrot.slane %v413_v31, 4  ;;  %v400_v33 = vmul.f32 %v399_v18, %v385_v30 }
 0x25f   :  { %v415_v34 = vadd.f32 %v414_v32, %v413_v31  ;;  %v402_v36 = vsub.f32 %v769_v13, %v400_v33 }
 0x261   :  { %v416_v37 = vrot.slane %v415_v34, 2  ;;  %v404_v38 = vmul.f32 %v402_v36, %v402_v36 }
 0x263   :  { %v417_v0 = vadd.f32 %v416_v37, %v415_v34  ;;  %v406_v39 = vsel %vm378_vm6, %v404_v38, 0.0 }
 0x264   :  { %v407_v8 = vrot.slane %v406_v39, 4 }
 0x265   :  { %v418_v40 = vrot.slane %v417_v0, 1 }
 0x266   :  { %v408_v41 = vadd.f32 %v407_v8, %v406_v39 }
 0x267   :  { %v419_v5 = vadd.f32 %v418_v40, %v417_v0 }
 0x268   :  { %v409_v42 = vrot.slane %v408_v41, 2 }
 0x269   :  { %v421_v10 = vmul.f32 %v419_v5, %v399_v18 }
 0x26a   :  { %v410_v43 = vadd.f32 %v409_v42, %v408_v41 }
 0x26b   :  { %v424_v44 = vadd.f32 1e-05, %v421_v10 }
 0x26c   :  { %v411_v11 = vrot.slane %v410_v43, 1 }
 0x26d   :  { %532 = vrsqrt.f32 %v424_v44  ;;  %vm441_vm9 = vweird.f32 %v424_v44 }
 0x26e   :  { %v412_v45 = vadd.f32 %v411_v11, %v410_v43 }
 0x270   :  { %v420_v46 = vmul.f32 %v412_v45, %v399_v18 }
 0x272   :  { %v423_v47 = vadd.f32 1e-05, %v420_v46 }
 0x273   :  { %v533_v2 = vpop.eup %532 }
 0x274   :  { %v436_v48 = vmul.f32 %v533_v2, %v424_v44  ;;  %534 = vrsqrt.f32 %v423_v47  ;;  %vm442_vm8 = vweird.f32 %v533_v2  ;;  %vm431_vm13 = vweird.f32 %v423_v47 }
 0x275   :  { %vm443_vm10 = vmor %vm441_vm9, %vm442_vm8 }
 0x276   :  { %v437_v49 = vmul.f32 %v533_v2, %v436_v48 }
 0x278   :  { %v438_v50 = vmul.f32 0.5, %v437_v49 }
 0x27a   :  { %v535_v51 = vpop.eup %534  ;;  %v439_v52 = vsub.f32 1.5, %v438_v50 }
 0x27b   :  { %v426_v53 = vmul.f32 %v535_v51, %v423_v47  ;;  %vm432_vm11 = vweird.f32 %v535_v51 }
 0x27c   :  { %v440_v54 = vmul.f32 %v533_v2, %v439_v52  ;;  %vm433_vm14 = vmor %vm431_vm13, %vm432_vm11 }
 0x27d   :  { %v427_v55 = vmul.f32 %v535_v51, %v426_v53 }
 0x27e   :  { %v444_v20 = vsel %vm443_vm10, %v533_v2, %v440_v54 }
 0x27f   :  { %v428_v56 = vmul.f32 0.5, %v427_v55  ;;  %v447_v60 = vrot.slane %v444_v20, 7 }
 0x281   :  { %v429_v57 = vsub.f32 1.5, %v428_v56 }
 0x283   :  { %v430_v58 = vmul.f32 %v535_v51, %v429_v57 }
 0x285   :  { %v434_v22 = vsel %vm433_vm14, %v535_v51, %v430_v58 }
 0x286   :  { %v449_v61 = vsel %vm448_vm12, %v434_v22, %v447_v60 }
 0x287   :  { %v451_v21 = vmul.f32 %v449_v61, %v422_v59 }
 0x289   :  { %v454_v63 = vperm.slane %v451_v21, 0  ;;  %v455_v1 = vperm.slane %v451_v21, 1 }
 0x28b   :  { %v459_v3 = vmul.f32 %v455_v1, %v401_v25  ;;  %v458_v4 = vmul.f32 %v454_v63, %v400_v33  ;;  %v467_v12 = vmul.f32 %v455_v1, %v762_v62  ;;  %v466_v16 = vmul.f32 %v454_v63, %v769_v13 }
 0x28d   :  { %v462_v6 = vrot.slane %v459_v3, 7 }
 0x28f   :  { %v463_v7 = vsel %vm448_vm12, %v458_v4, %v462_v6 }
 0x290   :  { %v465_v9 = vsub.f32 %v452_v35, %v463_v7 }
 0x292   :  { %v469_v14 = vperm.slane %v465_v9, 0  ;;  %v470_v15 = vperm.slane %v465_v9, 1 }
 0x294   :  { %v474_v17 = vadd.f32 %v470_v15, %v467_v12  ;;  %v473_v18 = vadd.f32 %v469_v14, %v466_v16 }
 0x296   :  { %v477_v19 = vrot.slane %v474_v17, 6 }
 0x298   :  { %v478_v23 = vsel %vm378_vm6, %v473_v18, %v477_v19 }
 0x299   :  { %480 = vst [vmem:[%s801_s10] sm:$0xf] %v478_v23 }

</bundles_post_ra>
